<compile_context>
chip_gen: v7x
topology: tpu7x:2x2x1
jax: 0.10.0
libtpu: 0.0.40
codegen_flags: <defaults>
</compile_context>

<pallas_src>
import functools

import jax
import jax.numpy as jnp
from jax.experimental import pallas as pl
from jax.experimental.pallas import tpu as pltpu


# Conservative for v7x (64 MiB physical VMEM); on v5e/v6e this could be raised
# toward ~96 MiB to allow even larger resident stripes.
_VMEM_LIMIT_BYTES = 48 * 1024 * 1024
_VMEM_BUDGET_BYTES = 40 * 1024 * 1024  # target per-stage working set


def _round_up(n, m):
    return ((n + m - 1) // m) * m


def _pad2(a, rows, cols):
    return jnp.pad(a, ((0, rows - a.shape[0]), (0, cols - a.shape[1])))


def choose_tiles(N):
    """Pick (n_pad, tm, tk) for the adjacency aggregation stages.

    n_pad is rounded up to the reduction tile tk so big tiles always divide it;
    a candidate tile is accepted only if the extra zero rows stay under ~12.5%
    of the graph (the padded rows/cols are mathematically inert).
    """
    n128 = _round_up(max(N, 1), 128)
    tk = 128
    for t in (2048, 1024, 512, 256, 128):
        if t > n128:
            continue
        waste = _round_up(N, t) - n128
        if waste == 0 or waste * 8 <= n128:
            tk = t
            break
    n_pad = _round_up(N, tk)
    tm = 128
    for t in (512, 256, 128):
        if t <= n_pad and n_pad % t == 0:
            tm = t
            break
    # Keep at least 2 row tiles so the "parallel" axis feeds both v7x cores.
    while tm > 128 and n_pad // tm < 2:
        tm //= 2
    return n_pad, tm, tk


def pad_and_cast_adj(adj, n_pad, compute_dtype=jnp.bfloat16):
    """Pad/cast the O(N^2) adjacency once per graph (hoist out of the per-call
    path); cast to the compute dtype *before* padding to halve wrapper traffic."""
    return _pad2(adj.astype(compute_dtype), n_pad, n_pad)


def _stage2_vmem(tm, tk, n_pad, h_pad, c_pad, resident, bs):
    return (2 * tm * tk * bs                                # adj tile (dbl buf)
            + 2 * (n_pad if resident else tk) * h_pad * bs  # support1
            + 2 * h_pad * c_pad * bs                        # W2
            + 2 * tm * c_pad * bs                           # support2 out
            + tm * h_pad * 4                                # f32 accumulator
            + 2 * 8 * h_pad * 4)                            # b1 (padded)


def _stage3_vmem(tm, tk, n_pad, c_pad, resident, bs):
    return (2 * tm * tk * bs
            + 2 * (n_pad if resident else tk) * c_pad * bs  # support2
            + 2 * tm * c_pad * 4                            # f32 out
            + tm * c_pad * 4                                # f32 accumulator
            + 2 * 8 * c_pad * 4)                            # b2 (padded)


# ---------------------------------------------------------------------------
# Kernel 1: support1 = x @ W1   (hoisted out of the adj row-tile loop)
# ---------------------------------------------------------------------------
def _support_kernel(x_ref, w_ref, out_ref):
    out_ref[...] = jnp.dot(
        x_ref[...], w_ref[...], preferred_element_type=jnp.float32
    ).astype(out_ref.dtype)


# ---------------------------------------------------------------------------
# Kernel 2: layer-1 aggregation fused with the layer-2 projection:
#   acc = sum_k adj[i, k] @ support1[k]        (K-reduction on MXU, f32 acc)
#   h   = relu(acc + b1)                       (epilogue, once per row tile)
#   out = h @ W2  (== support2)                (epilogue, bf16 store)
# Dropout is identity at inference.
# TODO(synk): training-mode dropout would need pltpu.prng_seed/prng_random_bits.
# ---------------------------------------------------------------------------
def _layer1_kernel(adj_ref, s1_ref, b1_ref, w2_ref, s2_ref, acc_ref,
                   *, tk, s1_resident):
    k = pl.program_id(1)

    @pl.when(k == 0)
    def _():
        acc_ref[...] = jnp.zeros_like(acc_ref)

    if s1_resident:
        start = pl.multiple_of(k * tk, tk)
        s1 = s1_ref[pl.ds(start, tk), :]
    else:
        s1 = s1_ref[...]

    acc_ref[...] += jnp.dot(
        adj_ref[...], s1, preferred_element_type=jnp.float32)

    @pl.when(k == pl.num_programs(1) - 1)
    def _():
        h = jnp.maximum(acc_ref[...] + b1_ref[...], 0.0)
        s2_ref[...] = jnp.dot(
            h.astype(w2_ref.dtype), w2_ref[...],
            preferred_element_type=jnp.float32,
        ).astype(s2_ref.dtype)


# ---------------------------------------------------------------------------
# Kernel 3: layer-2 aggregation + bias + masked row softmax (exact divide)
# ---------------------------------------------------------------------------
def _layer2_kernel(adj_ref, s2_ref, b2_ref, out_ref, acc_ref,
                   *, tk, s2_resident, nclass):
    k = pl.program_id(1)

    @pl.when(k == 0)
    def _():
        acc_ref[...] = jnp.zeros_like(acc_ref)

    if s2_resident:
        start = pl.multiple_of(k * tk, tk)
        s2 = s2_ref[pl.ds(start, tk), :]
    else:
        s2 = s2_ref[...]

    acc_ref[...] += jnp.dot(
        adj_ref[...], s2, preferred_element_type=jnp.float32)

    @pl.when(k == pl.num_programs(1) - 1)
    def _():
        logits = acc_ref[...] + b2_ref[...]
        # Mask padded class lanes before the softmax reduction.
        col = jax.lax.broadcasted_iota(jnp.int32, logits.shape, 1)
        logits = jnp.where(col < nclass, logits, -1e30)
        m = jnp.max(logits, axis=1, keepdims=True)
        e = jnp.exp(logits - m)
        denom = jnp.sum(e, axis=1, keepdims=True)
        out_ref[...] = e / denom  # exact divide: rows sum to 1


def gcn_forward(x, adj, w1, b1, w2, b2, *, compute_dtype=jnp.bfloat16,
                adj_padded=None):
    """softmax(adj @ (relu(adj @ (x @ W1) + b1) @ W2) + b2, axis=1)."""
    N, nfeat = x.shape
    nhid = w1.shape[1]
    nclass = w2.shape[1]

    n_pad, tm, tk = choose_tiles(N)
    f_pad = _round_up(nfeat, 128)
    h_pad = _round_up(nhid, 128)
    c_pad = _round_up(nclass, 128)

    bs = jnp.dtype(compute_dtype).itemsize
    n_i = n_pad // tm
    n_k = n_pad // tk

    if adj_padded is None:
        adj_p = pad_and_cast_adj(adj, n_pad, compute_dtype)
    else:
        assert adj_padded.shape == (n_pad, n_pad), "adj_padded has wrong n_pad"
        adj_p = adj_padded.astype(compute_dtype)

    x_p = _pad2(x.astype(compute_dtype), n_pad, f_pad)
    w1_p = _pad2(w1.astype(compute_dtype), f_pad, h_pad)
    w2_p = _pad2(w2.astype(compute_dtype), h_pad, c_pad)
    b1_p = _pad2(jnp.asarray(b1, jnp.float32).reshape(1, -1), 1, h_pad)
    b2_p = _pad2(jnp.asarray(b2, jnp.float32).reshape(1, -1), 1, c_pad)

    # Keep support1 / support2 VMEM-resident across the K reduction when they
    # fit under the (v7x-safe) budget; otherwise stream (tk, ·) tiles per step.
    s1_resident = _stage2_vmem(tm, tk, n_pad, h_pad, c_pad, True, bs) \
        <= _VMEM_BUDGET_BYTES
    s2_resident = _stage3_vmem(tm, tk, n_pad, c_pad, True, bs) \
        <= _VMEM_BUDGET_BYTES

    # ---- Stage 1: support1 = x @ W1 --------------------------------------
    s1 = pl.pallas_call(
        _support_kernel,
        out_shape=jax.ShapeDtypeStruct((n_pad, h_pad), compute_dtype),
        grid_spec=pltpu.PrefetchScalarGridSpec(
            num_scalar_prefetch=0,
            grid=(n_i,),
            in_specs=[
                pl.BlockSpec((tm, f_pad), lambda i: (i, 0)),
                pl.BlockSpec((f_pad, h_pad), lambda i: (0, 0)),
            ],
            out_specs=pl.BlockSpec((tm, h_pad), lambda i: (i, 0)),
        ),
        compiler_params=pltpu.CompilerParams(
            dimension_semantics=("parallel",),
            vmem_limit_bytes=_VMEM_LIMIT_BYTES),
        cost_estimate=pl.CostEstimate(
            flops=2 * n_pad * f_pad * h_pad,
            transcendentals=0,
            bytes_accessed=(n_pad * f_pad + f_pad * h_pad + n_pad * h_pad) * bs),
    )(x_p, w1_p)

    # ---- Stage 2: support2 = relu(adj @ support1 + b1) @ W2 --------------
    s1_spec = (pl.BlockSpec((n_pad, h_pad), lambda i, k: (0, 0)) if s1_resident
               else pl.BlockSpec((tk, h_pad), lambda i, k: (k, 0)))
    s1_bytes = (n_pad * h_pad if s1_resident else n_i * n_pad * h_pad) * bs
    s2 = pl.pallas_call(
        functools.partial(_layer1_kernel, tk=tk, s1_resident=s1_resident),
        out_shape=jax.ShapeDtypeStruct((n_pad, c_pad), compute_dtype),
        grid_spec=pltpu.PrefetchScalarGridSpec(
            num_scalar_prefetch=0,
            grid=(n_i, n_k),
            in_specs=[
                pl.BlockSpec((tm, tk), lambda i, k: (i, k)),        # adj tile
                s1_spec,                                            # support1
                pl.BlockSpec((1, h_pad), lambda i, k: (0, 0)),      # b1
                pl.BlockSpec((h_pad, c_pad), lambda i, k: (0, 0)),  # W2
            ],
            out_specs=pl.BlockSpec((tm, c_pad), lambda i, k: (i, 0)),
            scratch_shapes=[pltpu.VMEM((tm, h_pad), jnp.float32)],
        ),
        compiler_params=pltpu.CompilerParams(
            dimension_semantics=("parallel", "arbitrary"),
            vmem_limit_bytes=_VMEM_LIMIT_BYTES),
        cost_estimate=pl.CostEstimate(
            flops=2 * n_pad * n_pad * h_pad + 2 * n_pad * h_pad * c_pad,
            transcendentals=0,
            bytes_accessed=(n_pad * n_pad * bs + s1_bytes
                            + h_pad * c_pad * bs + n_pad * c_pad * bs
                            + h_pad * 4)),
    )(adj_p, s1, b1_p, w2_p)

    # ---- Stage 3: out = softmax(adj @ support2 + b2) ----------------------
    s2_spec = (pl.BlockSpec((n_pad, c_pad), lambda i, k: (0, 0)) if s2_resident
               else pl.BlockSpec((tk, c_pad), lambda i, k: (k, 0)))
    s2_bytes = (n_pad * c_pad if s2_resident else n_i * n_pad * c_pad) * bs
    out_p = pl.pallas_call(
        functools.partial(_layer2_kernel, tk=tk, s2_resident=s2_resident,
                          nclass=nclass),
        out_shape=jax.ShapeDtypeStruct((n_pad, c_pad), jnp.float32),
        grid_spec=pltpu.PrefetchScalarGridSpec(
            num_scalar_prefetch=0,
            grid=(n_i, n_k),
            in_specs=[
                pl.BlockSpec((tm, tk), lambda i, k: (i, k)),      # adj tile
                s2_spec,                                          # support2
                pl.BlockSpec((1, c_pad), lambda i, k: (0, 0)),    # b2
            ],
            out_specs=pl.BlockSpec((tm, c_pad), lambda i, k: (i, 0)),
            scratch_shapes=[pltpu.VMEM((tm, c_pad), jnp.float32)],
        ),
        compiler_params=pltpu.CompilerParams(
            dimension_semantics=("parallel", "arbitrary"),
            vmem_limit_bytes=_VMEM_LIMIT_BYTES),
        cost_estimate=pl.CostEstimate(
            flops=2 * n_pad * n_pad * c_pad,
            transcendentals=n_pad * c_pad,
            bytes_accessed=(n_pad * n_pad * bs + s2_bytes
                            + n_pad * c_pad * 4 + c_pad * 4)),
    )(adj_p, s2, b2_p)

    # Slice away the row/lane padding.
    return out_p[:N, :nclass]


def reference_forward(x, adj, w1, b1, w2, b2, compute_dtype=jnp.float32):
    cd = compute_dtype
    f32 = jnp.float32
    adj_c = adj.astype(cd)
    s1 = jnp.dot(x.astype(cd), w1.astype(cd), preferred_element_type=f32).astype(cd)
    h = jnp.maximum(jnp.dot(adj_c, s1, preferred_element_type=f32) + b1, 0.0)
    s2 = jnp.dot(h.astype(cd), w2.astype(cd), preferred_element_type=f32).astype(cd)
    logits = jnp.dot(adj_c, s2, preferred_element_type=f32) + b2
    return jax.nn.softmax(logits, axis=1)


if __name__ == "__main__":
    # Small shapes consistent with the module: N nodes, nfeat -> nhid -> nclass
    N, nfeat, nhid, nclass = 16, 32, 16, 8

    key = jax.random.PRNGKey(0)
    kx, kadj, kw1, kb1, kw2, kb2 = jax.random.split(key, 6)

    x = jax.random.normal(kx, (N, nfeat), dtype=jnp.float32)

    # Symmetric row-normalized adjacency with self-loops (typical GCN input).
    a = (jax.random.uniform(kadj, (N, N)) > 0.7).astype(jnp.float32)
    a = jnp.maximum(a, a.T) + jnp.eye(N, dtype=jnp.float32)
    adj = a / jnp.sum(a, axis=1, keepdims=True)

    # Init matching GraphConvolution.reset_parameters: U(-stdv, stdv),
    # stdv = 1/sqrt(out_features).
    stdv1 = 1.0 / (nhid ** 0.5)
    w1 = jax.random.uniform(kw1, (nfeat, nhid), minval=-stdv1, maxval=stdv1,
                            dtype=jnp.float32)
    b1 = jax.random.uniform(kb1, (nhid,), minval=-stdv1, maxval=stdv1,
                            dtype=jnp.float32)
    stdv2 = 1.0 / (nclass ** 0.5)
    w2 = jax.random.uniform(kw2, (nhid, nclass), minval=-stdv2, maxval=stdv2,
                            dtype=jnp.float32)
    b2 = jax.random.uniform(kb2, (nclass,), minval=-stdv2, maxval=stdv2,
                            dtype=jnp.float32)

    # Hoist the O(N^2) adjacency pad/cast out of the per-call path: compute it
    # once per graph and reuse it for every forward call.
    n_pad, _, _ = choose_tiles(N)
    adj_padded = jax.block_until_ready(pad_and_cast_adj(adj, n_pad))

    out = gcn_forward(x, adj, w1, b1, w2, b2, adj_padded=adj_padded)
    out = jax.block_until_ready(out)

    ref_matched = reference_forward(x, adj, w1, b1, w2, b2, jnp.bfloat16)
    ref_f32 = reference_forward(x, adj, w1, b1, w2, b2, jnp.float32)

    assert out.shape == (N, nclass)
    assert bool(jnp.all(jnp.isfinite(out))), "non-finite outputs"
    assert jnp.allclose(out, ref_matched, atol=1e-2), \
        "mismatch vs matched-precision (bf16 MXU) reference"
    assert jnp.allclose(out, ref_f32, atol=5e-2), "mismatch vs f32 reference"
    assert jnp.allclose(jnp.sum(out, axis=1), 1.0, atol=1e-3), \
        "softmax rows must sum to 1"

    print("KERNEL_OK")
</pallas_src>

<mosaic_0001>
module attributes {stable_mosaic.version = 11 : i64} {
  func.func @_support_kernel(%arg0: i32, %arg1: memref<128x128xbf16, #tpu.memory_space<vmem>>, %arg2: memref<128x128xbf16, #tpu.memory_space<vmem>>, %arg3: memref<128x128xbf16, #tpu.memory_space<vmem>>) attributes {dimension_semantics = [#tpu.dimension_semantics<parallel>], iteration_bounds = array<i64: 1>, scalar_prefetch = 0 : i64, scratch_operands = 0 : i64, tpu.core_type = #tpu.core_type<tc>, window_params = [{transform_indices = @transform_0, window_bounds = array<i64: 128, 128>}, {pipeline_mode = #tpu.pipeline_mode<synchronous>, transform_indices = @transform_1, window_bounds = array<i64: 128, 128>}, {transform_indices = @transform_2, window_bounds = array<i64: 128, 128>}]} {
    %c0 = arith.constant 0 : index
    %c0_0 = arith.constant 0 : index
    %0 = vector.load %arg1[%c0, %c0_0] : memref<128x128xbf16, #tpu.memory_space<vmem>>, vector<128x128xbf16>
    %c0_1 = arith.constant 0 : index
    %c0_2 = arith.constant 0 : index
    %1 = vector.load %arg2[%c0_1, %c0_2] : memref<128x128xbf16, #tpu.memory_space<vmem>>, vector<128x128xbf16>
    %cst = arith.constant dense<0.000000e+00> : vector<128x128xf32>
    %2 = tpu.matmul %0, %1, %cst {dimension_numbers = #tpu.dot_dimension_numbers<[1], [0], [0], [1], [0, 0, 1, 1], [], []>} : vector<128x128xbf16>, vector<128x128xbf16>, vector<128x128xf32> -> vector<128x128xf32>
    %3 = arith.truncf %2 : vector<128x128xf32> to vector<128x128xbf16>
    %c0_3 = arith.constant 0 : index
    %c0_4 = arith.constant 0 : index
    %4 = vector.load %arg3[%c0_3, %c0_4] : memref<128x128xbf16, #tpu.memory_space<vmem>>, vector<128x128xbf16>
    tpu.vector_store %arg3[%c0_3, %c0_4], %3 {strides = array<i32>} : memref<128x128xbf16, #tpu.memory_space<vmem>>, vector<128x128xbf16>,
    return
  }
  func.func @transform_0(%arg0: i32) -> (i32, i32) {
    %c0_i32 = arith.constant 0 : i32
    %c0_i32_0 = arith.constant 0 : i32
    return %arg0, %c0_i32 : i32, i32
  }
  func.func @transform_1(%arg0: i32) -> (i32, i32) {
    %c0_i32 = arith.constant 0 : i32
    %c0_i32_0 = arith.constant 0 : i32
    %c0_i32_1 = arith.constant 0 : i32
    return %c0_i32, %c0_i32_0 : i32, i32
  }
  func.func @transform_2(%arg0: i32) -> (i32, i32) {
    %c0_i32 = arith.constant 0 : i32
    %c0_i32_0 = arith.constant 0 : i32
    return %arg0, %c0_i32 : i32, i32
  }
}

</mosaic_0001>

<bundles_post_ra>
// kernel: tpu_custom_call.1
= control target key start
LH: loop header
LB: loop body
LE: loop exit
PB: predicated region body
PF: predicated region fallthrough
CT: control target
= control target key end

     0   :  { %7 = vsyncpa [#allocation3], 0  ;;  %s681_s0 = inlined_call_operand.hbm [shape: bf16[128,128], index: 0, kind: input, shape index: {}]   ;;  %s682_s1 = inlined_call_operand.hbm [shape: bf16[128,128], index: 1, kind: input, shape index: {}]   ;;  %s683_s2 = inlined_call_operand.hbm [shape: bf16[128,128], index: 2, kind: output, shape index: {}]  }
   0x1   :  { %8 = vsyncpa [#allocation6], 0 }
   0x2   :  { %9 = vsyncpa [#allocation4], 0  ;;  %s616_s9 = smov [#allocation2]   ;;  %s544_s13 = scalar_lea.hbm %s681_s0, 1024 }
   0x3   :  { %s15_s10 = sshll.u32 %s616_s9, 4  ;;  %p545_p0 = scmp.ne.s32.totalorder %s681_s0, %s544_s13  ;;  %s16_s10 = int_to_ptr.vmem [resolvable:$true] %s15_s10 }
   0x4   :  { %p548_p1 = scmp.lt.u32.totalorder %s544_s13, %s681_s0 }
   0x6   :  { %p550_p2 = pnand %p548_p1, %p545_p0 }
   0x8   :  { %553 = shalt.err (!%p550_p2)
}
   0x9   :  { %s554_s18 = scalar_lea.vmem %s16_s10, 1024  ;;  %p559_p4 = scmp.lt.s32.totalorder %s16_s10, %s16_s10 }
   0xa   :  { %p555_p3 = scmp.ne.s32.totalorder %s16_s10, %s554_s18  ;;  %p560_p5 = scmp.lt.s32.totalorder %s554_s18, %s554_s18 }
   0xc   :  { %p561_p6 = por %p560_p5, %p559_p4 }
   0xe   :  { %p562_p7 = pnand %p561_p6, %p555_p3 }
  0x10   :  { %565 = shalt.err (!%p562_p7)
}
  0x11   :  { %s617_s19 = smov 64   ;;  %s618_s20 = smov 4  }
  0x12   :  { %21 = dma.hbm_to_vmem [thread:$0]  %s681_s0, 1024, %s16_s10, [#allocation3], %s617_s19, %s617_s19, %s618_s20  }
  0x13   :  { %s619_s23 = smov [#allocation5]   ;;  %s566_s27 = scalar_lea.hbm %s682_s1, 1024 }
  0x14   :  { %s27_s24 = sshll.u32 %s619_s23, 4  ;;  %p567_p8 = scmp.ne.s32.totalorder %s682_s1, %s566_s27  ;;  %s28_s24 = int_to_ptr.vmem [resolvable:$true] %s27_s24 }
  0x15   :  { %p570_p9 = scmp.lt.u32.totalorder %s566_s27, %s682_s1 }
  0x17   :  { %p572_p10 = pnand %p570_p9, %p567_p8 }
  0x19   :  { %575 = shalt.err (!%p572_p10)
}
  0x1a   :  { %s576_s4 = scalar_lea.vmem %s28_s24, 1024  ;;  %p581_p12 = scmp.lt.s32.totalorder %s28_s24, %s28_s24 }
  0x1b   :  { %p577_p11 = scmp.ne.s32.totalorder %s28_s24, %s576_s4  ;;  %p582_p13 = scmp.lt.s32.totalorder %s576_s4, %s576_s4 }
  0x1d   :  { %p583_p0 = por %p582_p13, %p581_p12 }
  0x1f   :  { %p584_p1 = pnand %p583_p0, %p577_p11 }
  0x21   :  { %587 = shalt.err (!%p584_p1)
}
  0x22   :  { %33 = dma.hbm_to_vmem [thread:$0]  %s682_s1, 1024, %s28_s24, [#allocation6], %s617_s19, %s617_s19, %s618_s20  }
  0x23   :  { %610 = dma.done.wait [#allocation3], 1024  }
  0x24   :  { %611 = vsyncadd [#allocation3], 4294966272 }
  0x25   :  { %612 = dma.done.wait [#allocation6], 1024  }
  0x26   :  { %613 = vsyncadd [#allocation6], 4294966272  ;;  %v528_v0 = vld [vmem:[#allocation5] sm:$0xff]   ;;  %v529_v1 = vld [vmem:[#allocation5 + $0x8] sm:$0xff]   ;;  %s620_s1 = smov [#allocation7]  }
  0x27   :  { %475 = vmatprep.subr.bf16.mxu0 %v528_v0  ;;  %507 = vmatprep.subr.bf16.mxu1 %v528_v0  ;;  %v530_v2 = vld [vmem:[#allocation5 + $0x10] sm:$0xff]   ;;  %v531_v3 = vld [vmem:[#allocation5 + $0x18] sm:$0xff]   ;;  %v536_v4 = vld [vmem:[#allocation2] sm:$0xff]   ;;  %s351_s6 = sshll.u32 %s620_s1, 4  ;;  %s352_s6 = int_to_ptr.vmem [resolvable:$true] %s351_s6 }
  0x28   :  { %476 = vmatpush3.bf16.msra.mxu0 %v528_v0  ;;  %515 = vmatpush3.bf16.msra.mxu1 %v528_v0  ;;  %v537_v5 = vld [vmem:[#allocation2 + $0x20] sm:$0xff]   ;;  %v533_v7 = vld [vmem:[#allocation5 + $0x28] sm:$0xff]   ;;  %v534_v8 = vld [vmem:[#allocation5 + $0x30] sm:$0xff]   ;;  %s588_s7 = scalar_lea.vmem %s352_s6, 1024  ;;  %p593_p3 = scmp.lt.s32.totalorder %s352_s6, %s352_s6 }
  0x29   :  { %477 = vmatprep.subr.bf16.mxu0 %v529_v1  ;;  %508 = vmatprep.subr.bf16.mxu1 %v529_v1  ;;  %v532_v6 = vld [vmem:[#allocation5 + $0x20] sm:$0xff]   ;;  %v535_v9 = vld [vmem:[#allocation5 + $0x38] sm:$0xff]   ;;  %v538_v10 = vld [vmem:[#allocation2 + $0x8] sm:$0xff]   ;;  %p589_p2 = scmp.ne.s32.totalorder %s352_s6, %s588_s7  ;;  %p594_p4 = scmp.lt.s32.totalorder %s588_s7, %s588_s7 }
  0x2a   :  { %491 = vmatprep.mubr.bf16.mxu0 %v536_v4  ;;  %499 = vmatprep.mubr.bf16.mxu1 %v537_v5  ;;  %v539_v11 = vld [vmem:[#allocation2 + $0x28] sm:$0xff]   ;;  %v540_v12 = vld [vmem:[#allocation2 + $0x10] sm:$0xff]   ;;  %v542_v14 = vld [vmem:[#allocation2 + $0x18] sm:$0xff]  }
  0x2b   :  { %v541_v13 = vld [vmem:[#allocation2 + $0x30] sm:$0xff]   ;;  %v543_v15 = vld [vmem:[#allocation2 + $0x38] sm:$0xff]   ;;  %p595_p5 = por %p594_p4, %p593_p3 }
  0x2c   :  { %478 = vmatpush3.bf16.msra.mxu0 %v529_v1  ;;  %516 = vmatpush3.bf16.msra.mxu1 %v529_v1 }
  0x2d   :  { %479 = vmatprep.subr.bf16.mxu0 %v530_v2  ;;  %509 = vmatprep.subr.bf16.mxu1 %v530_v2  ;;  %p596_p6 = pnand %p595_p5, %p589_p2 }
  0x30   :  { %480 = vmatpush3.bf16.msra.mxu0 %v530_v2  ;;  %517 = vmatpush3.bf16.msra.mxu1 %v530_v2 }
  0x31   :  { %481 = vmatprep.subr.bf16.mxu0 %v531_v3  ;;  %510 = vmatprep.subr.bf16.mxu1 %v531_v3 }
  0x34   :  { %482 = vmatpush3.bf16.msra.mxu0 %v531_v3  ;;  %518 = vmatpush3.bf16.msra.mxu1 %v531_v3 }
  0x35   :  { %483 = vmatprep.subr.bf16.mxu0 %v532_v6  ;;  %511 = vmatprep.subr.bf16.mxu1 %v532_v6 }
  0x38   :  { %484 = vmatpush3.bf16.msra.mxu0 %v532_v6  ;;  %519 = vmatpush3.bf16.msra.mxu1 %v532_v6 }
  0x39   :  { %485 = vmatprep.subr.bf16.mxu0 %v533_v7  ;;  %512 = vmatprep.subr.bf16.mxu1 %v533_v7 }
  0x3c   :  { %486 = vmatpush3.bf16.msra.mxu0 %v533_v7  ;;  %520 = vmatpush3.bf16.msra.mxu1 %v533_v7 }
  0x3d   :  { %487 = vmatprep.subr.bf16.mxu0 %v534_v8  ;;  %513 = vmatprep.subr.bf16.mxu1 %v534_v8 }
  0x40   :  { %488 = vmatpush3.bf16.msra.mxu0 %v534_v8  ;;  %521 = vmatpush3.bf16.msra.mxu1 %v534_v8 }
  0x41   :  { %489 = vmatprep.subr.bf16.mxu0 %v535_v9  ;;  %514 = vmatprep.subr.bf16.mxu1 %v535_v9 }
  0x44   :  { %490 = vmatpush3.bf16.msra.mxu0 %v535_v9  ;;  %522 = vmatpush3.bf16.msra.mxu1 %v535_v9 }
  0x47   :  { %492 = vmatmul.mubr.bf16.vlgmr.msra.gmra.mrb[0].mxu0 %v538_v10  ;;  %500 = vmatmul.mubr.bf16.vlgmr.msra.gmra.mrb[0].mxu1 %v539_v11 }
  0x48   :  { %495 = vmatprep.mubr.bf16.mxu0 %v540_v12  ;;  %503 = vmatprep.mubr.bf16.mxu1 %v541_v13 }
  0x4f   :  { %496 = vmatmul.mubr.bf16.gmra.mrb[4].mxu0 %v542_v14  ;;  %504 = vmatmul.mubr.bf16.gmra.mrb[4].mxu1 %v543_v15 }
 0x11a   :  { %v493_v16 = vpop.f32.mrb[0].mxu0  ;;  %v501_v17 = vpop.f32.mrb[0].mxu1 }
 0x11b   :  { %v203_v18 = vpop.f32.mrb[1].mxu0  ;;  %v235_v19 = vpop.f32.mrb[1].mxu1 }
 0x11c   :  { %v494_v20 = vpop.f32.mrb[2].mxu0  ;;  %v502_v21 = vpop.f32.mrb[2].mxu1 }
 0x11d   :  { %v420_v22 = vpack.c.bf16 %v494_v20, %v493_v16  ;;  %v440_v23 = vpack.c.bf16 %v502_v21, %v501_v17  ;;  %v206_v24 = vpop.f32.mrb[3].mxu0  ;;  %v238_v25 = vpop.f32.mrb[3].mxu1 }
 0x11e   :  { %v415_v26 = vpack.c.bf16 %v206_v24, %v203_v18  ;;  %v435_v27 = vpack.c.bf16 %v238_v25, %v235_v19 }
 0x11f   :  { %452 = vst [vmem:[#allocation7 + $0x8] sm:$0xff] %v420_v22   ;;  %456 = vst [vmem:[#allocation7 + $0x28] sm:$0xff] %v440_v23  }
 0x120   :  { %416 = vst [vmem:[#allocation7] sm:$0xff] %v415_v26   ;;  %455 = vst [vmem:[#allocation7 + $0x20] sm:$0xff] %v435_v27  }
 0x122   :  { %v497_v28 = vpop.f32.mrb[4].mxu0  ;;  %v505_v29 = vpop.f32.mrb[4].mxu1 }
 0x123   :  { %v219_v30 = vpop.f32.mrb[5].mxu0  ;;  %v251_v31 = vpop.f32.mrb[5].mxu1 }
 0x124   :  { %v498_v32 = vpop.f32.mrb[6].mxu0  ;;  %v506_v33 = vpop.f32.mrb[6].mxu1 }
 0x125   :  { %v430_v34 = vpack.c.bf16 %v498_v32, %v497_v28  ;;  %v450_v35 = vpack.c.bf16 %v506_v33, %v505_v29  ;;  %v222_v36 = vpop.f32.mrb[7].mxu0  ;;  %v254_v37 = vpop.f32.mrb[7].mxu1 }
 0x126   :  { %v425_v38 = vpack.c.bf16 %v222_v36, %v219_v30  ;;  %v445_v39 = vpack.c.bf16 %v254_v37, %v251_v31 }
 0x127   :  { %454 = vst [vmem:[#allocation7 + $0x18] sm:$0xff] %v430_v34   ;;  %458 = vst [vmem:[#allocation7 + $0x38] sm:$0xff] %v450_v35  }
 0x128   :  { %453 = vst [vmem:[#allocation7 + $0x10] sm:$0xff] %v425_v38   ;;  %457 = vst [vmem:[#allocation7 + $0x30] sm:$0xff] %v445_v39  }
 0x129   :  { %599 = shalt.err (!%p596_p6)
}
 0x12a   :  { %s600_s10 = scalar_lea.hbm %s683_s2, 1024 }
 0x12b   :  { %p601_p7 = scmp.ne.s32.totalorder %s683_s2, %s600_s10  ;;  %p604_p8 = scmp.lt.u32.totalorder %s600_s10, %s683_s2 }
 0x12d   :  { %p606_p9 = pnand %p604_p8, %p601_p7 }
 0x12f   :  { %609 = shalt.err (!%p606_p9)
}
 0x130   :  { %357 = dma.vmem_to_hbm [thread:$0]  %s352_s6, 1024, %s683_s2, [#allocation4], %s617_s19, %s617_s19, %s618_s20  }
 0x131   :  { %614 = dma.done.wait [#allocation4], 1024  }
 0x132   :  { %615 = vsyncadd [#allocation4], 4294966272 }
 0x133   :  { %361 = vsyncpa [#allocation3], 1 }
 0x134   :  { %362 = vsyncpa [#allocation6], 1 }
 0x135   :  { %363 = vsyncpa [#allocation4], 1 }

</bundles_post_ra>
